<compile_context>
chip_gen: v7x
topology: tpu7x:2x2x1
jax: 0.10.0
libtpu: 0.0.40
codegen_flags: <defaults>
</compile_context>

<pallas_src>
import functools
from typing import NamedTuple

import jax
import jax.numpy as jnp
from jax.experimental import pallas as pl
from jax.experimental.pallas import tpu as pltpu


# ----------------------------- small helpers --------------------------------
def _round_up(x: int, m: int) -> int:
    return ((x + m - 1) // m) * m


def _sublane_multiple(dtype) -> int:
    itemsize = jnp.dtype(dtype).itemsize
    return {4: 8, 2: 16, 1: 32}.get(itemsize, 8)


def _vmem_budget_bytes() -> int:
    """Per-generation VMEM budget with headroom for compiler scratch."""
    try:
        cap = int(pltpu.get_tpu_info().vmem_capacity_bytes)
    except Exception:
        cap = 64 * 1024 * 1024  # conservative default (v7x-sized)
    # 64 MiB chip (v7x)   -> ~48 MiB budget
    # 128 MiB chip (v5e/6e) -> capped at ~96 MiB
    return min(int(0.75 * cap), 100 * 1024 * 1024)


def _working_set_bytes(tm: int, tn: int, tk: int, itemsize: int) -> int:
    return (
        2 * (tm * tk + tk * tn) * itemsize  # double-buffered x and W tiles
        + tm * tn * 4                       # f32 accumulator scratch
        + 2 * tm * tn * itemsize            # double-buffered output tile
        + 2 * tn * itemsize                 # double-buffered bias tile
    )


def _shrink_to_budget(tm: int, tn: int, tk: int, itemsize: int, sub: int, budget: int):
    """Safety net: shrink tiles (tk first, then tn, then tm) to fit VMEM."""
    while _working_set_bytes(tm, tn, tk, itemsize) > budget and tk > 128:
        tk = max(128, (tk // 2 // 128) * 128)
    while _working_set_bytes(tm, tn, tk, itemsize) > budget and tn > 128:
        tn = max(128, (tn // 2 // 128) * 128)
    while _working_set_bytes(tm, tn, tk, itemsize) > budget and tm > sub:
        tm = max(sub, (tm // 2 // sub) * sub)
    return tm, tn, tk


# ------------------------------- the kernel ---------------------------------
def _linear_kernel(x_ref, w_ref, b_ref, o_ref, acc_ref):
    # x_ref:   (tm, tk)  activation tile
    # w_ref:   (tk, tn)  weight tile, pre-transposed (in, out) -> MXU-native
    # b_ref:   (1, tn)   bias tile
    # o_ref:   (tm, tn)  output tile (resident across the K axis)
    # acc_ref: (tm, tn)  f32 accumulator scratch
    k = pl.program_id(2)

    @pl.when(k == 0)
    def _():
        acc_ref[...] = jnp.zeros_like(acc_ref)

    acc_ref[...] += jnp.dot(
        x_ref[...], w_ref[...], preferred_element_type=jnp.float32
    )

    @pl.when(k == pl.num_programs(2) - 1)
    def _():
        o_ref[...] = (acc_ref[...] + b_ref[...].astype(jnp.float32)).astype(o_ref.dtype)


@functools.partial(
    jax.jit, static_argnames=("tm", "tn", "tk", "B", "out_size", "vmem_limit")
)
def _pallas_linear(xb_p, w_p, b_p, *, tm, tn, tk, B, out_size, vmem_limit):
    Mp, Kp = xb_p.shape
    _, Np = w_p.shape
    grid = (Mp // tm, Np // tn, Kp // tk)
    gm, gn, _ = grid

    isz = xb_p.dtype.itemsize
    cost = pl.CostEstimate(
        flops=2 * Mp * Np * Kp,
        transcendentals=0,
        bytes_accessed=(
            gn * Mp * Kp * isz                 # x re-read once per N block
            + gm * Kp * Np * w_p.dtype.itemsize  # W re-read once per M block
            + gm * Np * b_p.dtype.itemsize
            + Mp * Np * isz                    # output written once
        ),
    )

    out = pl.pallas_call(
        _linear_kernel,
        out_shape=jax.ShapeDtypeStruct((Mp, Np), xb_p.dtype),
        grid_spec=pltpu.PrefetchScalarGridSpec(
            num_scalar_prefetch=0,
            grid=grid,
            in_specs=[
                pl.BlockSpec((tm, tk), lambda i, j, k: (i, k)),  # x tile
                pl.BlockSpec((tk, tn), lambda i, j, k: (k, j)),  # W tile (in, out)
                pl.BlockSpec((1, tn), lambda i, j, k: (0, j)),   # bias tile
            ],
            out_specs=pl.BlockSpec((tm, tn), lambda i, j, k: (i, j)),
            scratch_shapes=[pltpu.VMEM((tm, tn), jnp.float32)],
        ),
        compiler_params=pltpu.CompilerParams(
            dimension_semantics=("parallel", "parallel", "arbitrary"),
            vmem_limit_bytes=vmem_limit,
        ),
        cost_estimate=cost,
    )(xb_p, w_p, b_p)

    return out[:B, :out_size]


# ------------------------ parameter prep (once, at init) --------------------
class LinearParams(NamedTuple):
    w_t: jax.Array     # (Kp, Np)  weight, transposed to (in, out) and padded
    b: jax.Array       # (1, Np)   bias, padded
    out_size: int
    in_size: int
    tm_target: int
    tn: int
    tk: int
    vmem_limit: int


def prepare_linear_params(weight: jax.Array, bias: jax.Array) -> LinearParams:
    """Transpose + pad the weight/bias once so per-call work is only on x."""
    out_size, in_size = weight.shape
    itemsize = weight.dtype.itemsize
    sub = _sublane_multiple(weight.dtype)

    # Tile targets (dtype-aware): f32 512x512x1024, bf16/int8 512x1024x2048.
    if itemsize <= 2:
        tm_t, tn_t, tk_t = 512, 1024, 2048
    else:
        tm_t, tn_t, tk_t = 512, 512, 1024

    # N tile: prefer >=2 N blocks when batch may be small (megacore occupancy).
    np128 = _round_up(max(out_size, 1), 128)
    if np128 <= tn_t and out_size > 256:
        tn = _round_up(-(-out_size // 2), 128)
    else:
        tn = min(tn_t, np128)
    tk = min(tk_t, _round_up(max(in_size, 1), 128))

    budget = _vmem_budget_bytes()
    tm_t, tn, tk = _shrink_to_budget(tm_t, tn, tk, itemsize, sub, budget)

    est_ws = _working_set_bytes(tm_t, tn, tk, itemsize)
    vmem_limit = int(min(budget, max(int(1.5 * est_ws), 32 * 1024 * 1024)))

    Np = _round_up(out_size, tn)
    Kp = _round_up(in_size, tk)

    w_t = jnp.pad(weight.T, ((0, Kp - in_size), (0, Np - out_size)))
    b_p = jnp.pad(bias, ((0, Np - out_size),)).reshape((1, Np))

    return LinearParams(
        w_t=w_t, b=b_p, out_size=out_size, in_size=in_size,
        tm_target=tm_t, tn=tn, tk=tk, vmem_limit=vmem_limit,
    )


# ------------------------------ forward pass --------------------------------
_FAST_PATH_FLOPS = 1 << 22  # below ~4 Mflop, plain XLA beats kernel overhead


def apply_linear(x: jax.Array, params: LinearParams, *, force_pallas: bool = False):
    """y = x @ W.T + b with all leading dims of x preserved."""
    out_size, in_size = params.out_size, params.in_size
    lead_shape = x.shape[:-1]
    xb = x.reshape((-1, in_size))
    B = xb.shape[0]

    # Fast path: tiny problems go straight to XLA.
    if not force_pallas and 2 * B * out_size * in_size < _FAST_PATH_FLOPS:
        y = xb @ params.w_t[:in_size, :out_size] + params.b[0, :out_size]
        return y.reshape(lead_shape + (out_size,))

    sub = _sublane_multiple(x.dtype)
    tm = min(params.tm_target, _round_up(max(B, 1), sub))
    Mp = _round_up(B, tm)
    Kp = params.w_t.shape[0]

    # Only x needs per-call padding; W and b were padded once at init.
    xb_p = jnp.pad(xb, ((0, Mp - B), (0, Kp - in_size)))

    out = _pallas_linear(
        xb_p, params.w_t, params.b,
        tm=tm, tn=params.tn, tk=params.tk,
        B=B, out_size=out_size, vmem_limit=params.vmem_limit,
    )
    return out.reshape(lead_shape + (out_size,))


def linear_forward(x: jax.Array, weight: jax.Array, bias: jax.Array, **kw):
    """One-shot convenience wrapper (prepares params every call).

    For repeated calls, use prepare_linear_params(...) once + apply_linear(...).
    """
    return apply_linear(x, prepare_linear_params(weight, bias), **kw)


# ----------------------------------- test -----------------------------------
if __name__ == "__main__":
    key = jax.random.PRNGKey(0)
    kx, kw, kb, kx2, kw2, kb2, kx3 = jax.random.split(key, 7)

    # Small shapes matching the module's signature: batch=2, in=32, out=16.
    batch, input_size, output_size = 2, 32, 16
    x = jax.random.normal(kx, (batch, input_size), dtype=jnp.float32)
    # PyTorch init is zeros; use random params so the matmul path is exercised.
    weight = jax.random.normal(kw, (output_size, input_size), dtype=jnp.float32) * 0.1
    bias = jax.random.normal(kb, (output_size,), dtype=jnp.float32) * 0.1

    params = prepare_linear_params(weight, bias)
    y_ref = x @ weight.T + bias

    # 1) Tiny shape -> fast path.
    y = apply_linear(x, params)
    jax.block_until_ready(y)
    assert y.shape == (batch, output_size)
    assert jnp.allclose(y, y_ref, atol=1e-5, rtol=1e-5)

    # 2) Same tiny shape forced through the Pallas kernel (padding path).
    y_pk = apply_linear(x, params, force_pallas=True)
    jax.block_until_ready(y_pk)
    assert jnp.allclose(y_pk, y_ref, atol=1e-5, rtol=1e-5)

    # 3) Leading dims besides the last are preserved (as in the PyTorch module).
    x3 = jax.random.normal(kx3, (2, 3, input_size), dtype=jnp.float32)
    y3 = apply_linear(x3, params, force_pallas=True)
    jax.block_until_ready(y3)
    y3_ref = x3 @ weight.T + bias
    assert y3.shape == (2, 3, output_size)
    assert jnp.allclose(y3, y3_ref, atol=1e-5, rtol=1e-5)

    # 4) A modestly larger, non-tile-aligned shape through the Pallas path
    #    (exercises multi-block N grid + K padding).
    b2, in2, out2 = 256, 384, 500
    x2 = jax.random.normal(kx2, (b2, in2), dtype=jnp.float32)
    w2 = jax.random.normal(kw2, (out2, in2), dtype=jnp.float32) * 0.05
    bb2 = jax.random.normal(kb2, (out2,), dtype=jnp.float32) * 0.05
    params2 = prepare_linear_params(w2, bb2)
    y2 = apply_linear(x2, params2)
    jax.block_until_ready(y2)
    y2_ref = x2 @ w2.T + bb2
    assert y2.shape == (b2, out2)
    assert jnp.allclose(y2, y2_ref, atol=1e-4, rtol=1e-4)

    print("KERNEL_OK")
</pallas_src>

<mosaic_0001>
module attributes {stable_mosaic.version = 11 : i64} {
  func.func @_linear_kernel(%arg0: i32, %arg1: i32, %arg2: i32, %arg3: memref<8x128xf32, #tpu.memory_space<vmem>>, %arg4: memref<128x128xf32, #tpu.memory_space<vmem>>, %arg5: memref<1x128xf32, #tpu.memory_space<vmem>>, %arg6: memref<8x128xf32, #tpu.memory_space<vmem>>, %arg7: memref<8x128xf32, #tpu.memory_space<vmem>>) attributes {dimension_semantics = [#tpu.dimension_semantics<parallel>, #tpu.dimension_semantics<parallel>, #tpu.dimension_semantics<arbitrary>], iteration_bounds = array<i64: 1, 1, 1>, scalar_prefetch = 0 : i64, scratch_operands = 1 : i64, tpu.core_type = #tpu.core_type<tc>, window_params = [{transform_indices = @transform_0, window_bounds = array<i64: 8, 128>}, {transform_indices = @transform_1, window_bounds = array<i64: 128, 128>}, {transform_indices = @transform_2, window_bounds = array<i64: 1, 128>}, {transform_indices = @transform_3, window_bounds = array<i64: 8, 128>}]} {
    %c0_i32 = arith.constant 0 : i32
    %0 = arith.cmpi eq, %arg2, %c0_i32 : i32
    %1 = arith.extui %0 : i1 to i32
    %c0_i32_0 = arith.constant 0 : i32
    %2 = arith.cmpi ne, %1, %c0_i32_0 : i32
    scf.if %2 {
      %cst_10 = arith.constant 0.000000e+00 : f32
      %12 = vector.broadcast %cst_10 : f32 to vector<8x128xf32>
      %c0_11 = arith.constant 0 : index
      %c0_12 = arith.constant 0 : index
      %13 = vector.load %arg7[%c0_11, %c0_12] : memref<8x128xf32, #tpu.memory_space<vmem>>, vector<8x128xf32>
      tpu.vector_store %arg7[%c0_11, %c0_12], %12 {strides = array<i32>} : memref<8x128xf32, #tpu.memory_space<vmem>>, vector<8x128xf32>,
    } else {
    }
    %c0 = arith.constant 0 : index
    %c0_1 = arith.constant 0 : index
    %3 = vector.load %arg7[%c0, %c0_1] : memref<8x128xf32, #tpu.memory_space<vmem>>, vector<8x128xf32>
    %c0_2 = arith.constant 0 : index
    %c0_3 = arith.constant 0 : index
    %4 = vector.load %arg3[%c0_2, %c0_3] : memref<8x128xf32, #tpu.memory_space<vmem>>, vector<8x128xf32>
    %c0_4 = arith.constant 0 : index
    %c0_5 = arith.constant 0 : index
    %5 = vector.load %arg4[%c0_4, %c0_5] : memref<128x128xf32, #tpu.memory_space<vmem>>, vector<128x128xf32>
    %cst = arith.constant dense<0.000000e+00> : vector<8x128xf32>
    %6 = tpu.matmul %4, %5, %cst {dimension_numbers = #tpu.dot_dimension_numbers<[1], [0], [0], [1], [0, 0, 1, 1], [], []>} : vector<8x128xf32>, vector<128x128xf32>, vector<8x128xf32> -> vector<8x128xf32>
    %7 = arith.addf %3, %6 : vector<8x128xf32>
    %c0_6 = arith.constant 0 : index
    %c0_7 = arith.constant 0 : index
    %8 = vector.load %arg7[%c0_6, %c0_7] : memref<8x128xf32, #tpu.memory_space<vmem>>, vector<8x128xf32>
    tpu.vector_store %arg7[%c0_6, %c0_7], %7 {strides = array<i32>} : memref<8x128xf32, #tpu.memory_space<vmem>>, vector<8x128xf32>,
    %c0_i32_8 = arith.constant 0 : i32
    %9 = arith.cmpi eq, %arg2, %c0_i32_8 : i32
    %10 = arith.extui %9 : i1 to i32
    %c0_i32_9 = arith.constant 0 : i32
    %11 = arith.cmpi ne, %10, %c0_i32_9 : i32
    scf.if %11 {
      %c0_10 = arith.constant 0 : index
      %c0_11 = arith.constant 0 : index
      %12 = vector.load %arg7[%c0_10, %c0_11] : memref<8x128xf32, #tpu.memory_space<vmem>>, vector<8x128xf32>
      %c0_12 = arith.constant 0 : index
      %c0_13 = arith.constant 0 : index
      %13 = vector.load %arg5[%c0_12, %c0_13] : memref<1x128xf32, #tpu.memory_space<vmem>>, vector<1x128xf32>
      %14 = vector.broadcast %13 : vector<1x128xf32> to vector<8x128xf32>
      %15 = arith.addf %12, %14 : vector<8x128xf32>
      %c0_14 = arith.constant 0 : index
      %c0_15 = arith.constant 0 : index
      %16 = vector.load %arg6[%c0_14, %c0_15] : memref<8x128xf32, #tpu.memory_space<vmem>>, vector<8x128xf32>
      tpu.vector_store %arg6[%c0_14, %c0_15], %15 {strides = array<i32>} : memref<8x128xf32, #tpu.memory_space<vmem>>, vector<8x128xf32>,
    } else {
    }
    return
  }
  func.func @transform_0(%arg0: i32, %arg1: i32, %arg2: i32) -> (i32, i32) {
    %c0_i32 = arith.constant 0 : i32
    return %arg0, %arg2 : i32, i32
  }
  func.func @transform_1(%arg0: i32, %arg1: i32, %arg2: i32) -> (i32, i32) {
    %c0_i32 = arith.constant 0 : i32
    return %arg2, %arg1 : i32, i32
  }
  func.func @transform_2(%arg0: i32, %arg1: i32, %arg2: i32) -> (i32, i32) {
    %c0_i32 = arith.constant 0 : i32
    %c0_i32_0 = arith.constant 0 : i32
    return %c0_i32, %arg1 : i32, i32
  }
  func.func @transform_3(%arg0: i32, %arg1: i32, %arg2: i32) -> (i32, i32) {
    %c0_i32 = arith.constant 0 : i32
    return %arg0, %arg1 : i32, i32
  }
}

</mosaic_0001>

<bundles_post_ra>
// kernel: _pallas_linear.1
= control target key start
LH: loop header
LB: loop body
LE: loop exit
PB: predicated region body
PF: predicated region fallthrough
CT: control target
= control target key end

     0   :  { %8 = vsyncpa [#allocation4], 0  ;;  %s350_s0 = inlined_call_operand.hbm [shape: f32[8,128], index: 0, kind: input, shape index: {}]   ;;  %s351_s1 = inlined_call_operand.hbm [shape: f32[128,128], index: 1, kind: input, shape index: {}]   ;;  %s352_s2 = inlined_call_operand.vmem [shape: f32[1,128], index: 2, kind: input, shape index: {}]   ;;  %s353_s3 = inlined_call_operand.vmem [shape: f32[8,128], index: 3, kind: output, shape index: {}]  }
   0x1   :  { %9 = vsyncpa [#allocation6], 0  ;;  %s286_s12 = smov [#allocation3]   ;;  %s287_s14 = smov [#allocation5]  }
   0x2   :  { %s16_s13 = sshll.u32 %s286_s12, 4  ;;  %s25_s15 = sshll.u32 %s287_s14, 4  ;;  %s17_s13 = int_to_ptr.vmem [resolvable:$true] %s16_s13  ;;  %s313_s15 = int_to_ptr.vmem [resolvable:$true] %s25_s15 }
   0x3   :  { %s238_s18 = scalar_lea.hbm %s350_s0, 128 }
   0x4   :  { %p239_p0 = scmp.ne.s32.totalorder %s350_s0, %s238_s18  ;;  %p242_p1 = scmp.lt.u32.totalorder %s238_s18, %s350_s0 }
   0x6   :  { %p244_p2 = pnand %p242_p1, %p239_p0 }
   0x8   :  { %247 = shalt.err (!%p244_p2)
}
   0x9   :  { %s248_s23 = scalar_lea.vmem %s17_s13, 128  ;;  %p253_p4 = scmp.lt.s32.totalorder %s17_s13, %s17_s13 }
   0xa   :  { %p249_p3 = scmp.ne.s32.totalorder %s17_s13, %s248_s23  ;;  %p254_p5 = scmp.lt.s32.totalorder %s248_s23, %s248_s23 }
   0xc   :  { %p255_p6 = por %p254_p5, %p253_p4 }
   0xe   :  { %p256_p7 = pnand %p255_p6, %p249_p3 }
  0x10   :  { %259 = shalt.err (!%p256_p7)
}
  0x11   :  { %19 = dma.hbm_to_vmem [thread:$0]  %s350_s0, 128, %s17_s13, [#allocation4]  }
  0x12   :  { %s260_s28 = scalar_lea.hbm %s351_s1, 2048 }
  0x13   :  { %p261_p8 = scmp.ne.s32.totalorder %s351_s1, %s260_s28  ;;  %p264_p9 = scmp.lt.u32.totalorder %s260_s28, %s351_s1 }
  0x15   :  { %p266_p10 = pnand %p264_p9, %p261_p8 }
  0x17   :  { %269 = shalt.err (!%p266_p10)
}
  0x18   :  { %s270_s6 = scalar_lea.vmem %s313_s15, 2048  ;;  %p275_p12 = scmp.lt.s32.totalorder %s313_s15, %s313_s15 }
  0x19   :  { %p271_p11 = scmp.ne.s32.totalorder %s313_s15, %s270_s6  ;;  %p276_p13 = scmp.lt.s32.totalorder %s270_s6, %s270_s6 }
  0x1b   :  { %p277_p0 = por %p276_p13, %p275_p12 }
  0x1d   :  { %p278_p1 = pnand %p277_p0, %p271_p11 }
  0x1f   :  { %281 = shalt.err (!%p278_p1)
}
  0x20   :  { %s288_s0 = smov 128   ;;  %s289_s7 = smov 8  }
  0x21   :  { %31 = dma.hbm_to_vmem [thread:$0]  %s351_s1, 2048, %s313_s15, [#allocation6], %s288_s0, %s288_s0, %s289_s7  }
  0x22   :  { %282 = dma.done.wait [#allocation4], 128  }
  0x23   :  { %283 = vsyncadd [#allocation4], 4294967168 }
  0x24   :  { %284 = dma.done.wait [#allocation6], 2048  }
  0x25   :  { %285 = vsyncadd [#allocation6], 4294965248  ;;  %v290_v0 = vmov 0.0|0.0   ;;  %vm291_vm0 = vmmov 0   ;;  %v292_v1 = vmov 0.0   ;;  %v47_v2 = vld [vmem:[#allocation5] sm:$0xff] }
  0x26   :  { %207 = vmatprep.subr.bf16.mxu0 %v290_v0  ;;  %204 = vmatprep.mubr.msk.f32.mxu0 %vm291_vm0, %v292_v1  ;;  %v48_v3 = vld [vmem:[#allocation5 + $0x8] sm:$0xff]  ;;  %v49_v4 = vld [vmem:[#allocation5 + $0x10] sm:$0xff]  ;;  %v50_v6 = vld [vmem:[#allocation5 + $0x18] sm:$0xff] }
  0x27   :  { %v208_v5 = vpack.c.bf16 %v48_v3, %v47_v2  ;;  %v211_v7 = vpack.c.bf16 %v50_v6, %v49_v4  ;;  %v51_v8 = vld [vmem:[#allocation5 + $0x20] sm:$0xff]  ;;  %v52_v9 = vld [vmem:[#allocation5 + $0x28] sm:$0xff]  ;;  %v53_v11 = vld [vmem:[#allocation5 + $0x30] sm:$0xff] }
  0x28   :  { %v214_v10 = vpack.c.bf16 %v52_v9, %v51_v8  ;;  %v54_v12 = vld [vmem:[#allocation5 + $0x38] sm:$0xff]  ;;  %v55_v14 = vld [vmem:[#allocation5 + $0x40] sm:$0xff]  ;;  %v56_v15 = vld [vmem:[#allocation5 + $0x48] sm:$0xff] }
  0x29   :  { %209 = vmatpush3.bf16.msra.mxu0 %v208_v5  ;;  %v217_v13 = vpack.c.bf16 %v54_v12, %v53_v11  ;;  %v220_v16 = vpack.c.bf16 %v56_v15, %v55_v14  ;;  %v57_v17 = vld [vmem:[#allocation5 + $0x50] sm:$0xff]  ;;  %v58_v18 = vld [vmem:[#allocation5 + $0x58] sm:$0xff]  ;;  %v59_v20 = vld [vmem:[#allocation5 + $0x60] sm:$0xff] }
  0x2a   :  { %210 = vmatprep.subr.bf16.mxu0 %v290_v0  ;;  %v223_v19 = vpack.c.bf16 %v58_v18, %v57_v17  ;;  %v60_v21 = vld [vmem:[#allocation5 + $0x68] sm:$0xff]  ;;  %v61_v23 = vld [vmem:[#allocation5 + $0x70] sm:$0xff]  ;;  %v62_v24 = vld [vmem:[#allocation5 + $0x78] sm:$0xff] }
  0x2b   :  { %v226_v22 = vpack.c.bf16 %v60_v21, %v59_v20  ;;  %v229_v25 = vpack.c.bf16 %v62_v24, %v61_v23  ;;  %v46_v26 = vld [vmem:[#allocation3] sm:$0xff]  ;;  %v154_v27 = vld [vmem:[%s352_s2] ss:$0 sm:$0xff] }
  0x2d   :  { %212 = vmatpush3.bf16.msra.mxu0 %v211_v7 }
  0x2e   :  { %213 = vmatprep.subr.bf16.mxu0 %v290_v0 }
  0x31   :  { %215 = vmatpush3.bf16.msra.mxu0 %v214_v10 }
  0x32   :  { %216 = vmatprep.subr.bf16.mxu0 %v290_v0 }
  0x35   :  { %218 = vmatpush3.bf16.msra.mxu0 %v217_v13 }
  0x36   :  { %219 = vmatprep.subr.bf16.mxu0 %v290_v0 }
  0x39   :  { %221 = vmatpush3.bf16.msra.mxu0 %v220_v16 }
  0x3a   :  { %222 = vmatprep.subr.bf16.mxu0 %v290_v0 }
  0x3d   :  { %224 = vmatpush3.bf16.msra.mxu0 %v223_v19 }
  0x3e   :  { %225 = vmatprep.subr.bf16.mxu0 %v290_v0 }
  0x41   :  { %227 = vmatpush3.bf16.msra.mxu0 %v226_v22 }
  0x42   :  { %228 = vmatprep.subr.bf16.mxu0 %v290_v0 }
  0x45   :  { %230 = vmatpush3.bf16.msra.mxu0 %v229_v25 }
  0x48   :  { %205 = vmatmul.mubr.f32.vlgmr.msra.gmra.mrb[0].mxu0 %v46_v26 }
 0x11b   :  { %v129_v28 = vpop.f32.mrb[0].mxu0 }
 0x11c   :  { %v146_v29 = vadd.f32 %v154_v27, %v129_v28  ;;  %v206_v30 = vpop.f32.mrb[1].mxu0 }
 0x11e   :  { %147 = vst [vmem:[%s353_s3] sm:$0xff] %v146_v29 }
 0x11f   :  { %152 = vsyncpa [#allocation4], 1 }
 0x120   :  { %153 = vsyncpa [#allocation6], 1 }

</bundles_post_ra>
